<compile_context>
chip_gen: v7x
topology: tpu7x:2x2x1
jax: 0.10.0
libtpu: 0.0.40
codegen_flags: <defaults>
</compile_context>

<pallas_src>
import jax
import jax.numpy as jnp
from jax.experimental import pallas as pl
from jax.experimental.pallas import tpu as pltpu

_COMPUTE_DT = jnp.bfloat16  # MXU operand dtype (accumulation is f32)
_IO_DT = jnp.bfloat16       # HBM I/O dtype for x / out (halves HBM traffic)


# ----------------------------- kernel helpers -----------------------------

def _softmax(x, axis):
    m = jnp.max(x, axis=axis, keepdims=True)
    e = jnp.exp(x - m)
    return e * pl.reciprocal(jnp.sum(e, axis=axis, keepdims=True), approx=True)


def _layernorm(x, gamma, beta, eps=1e-5):
    mu = jnp.mean(x, axis=-1, keepdims=True)
    xc = x - mu
    var = jnp.mean(xc * xc, axis=-1, keepdims=True)
    return xc * jax.lax.rsqrt(var + eps) * gamma + beta


# ------------------------------ Pallas kernel ------------------------------
# One grid point = (n index, batch block).  Full fused forward pass:
# embedded attention + residual/LN1 + MLP + residual/LN2.
#
# vecs_ref rows: 0=bqk, 1=bv, 2=b2, 3=g1, 4=be1, 5=g2, 6=be2, 7=pad.

def _ealayer_kernel(x_ref, emb_ref,
                    wqk_ref, wv_ref, w1_ref, w2_ref,
                    vecs_ref, b1_ref,
                    o_ref,
                    w_sc):
    bblk, s, d = x_ref.shape

    # ---- per-n cached (s, s) mixing matrix (reassociated attention) ----
    # W = q @ k^T with q = softmax_d(QK), k = softmax_s(QK); depends only on n
    # (grid axis 0), so compute once per n and reuse for every batch block.
    @pl.when(pl.program_id(1) == 0)
    def _():
        qk = jnp.dot(emb_ref[...], wqk_ref[...],
                     preferred_element_type=jnp.float32) + vecs_ref[0:1, :]   # (s, d)
        q = _softmax(qk, axis=-1)   # softmax over model_dim
        k = _softmax(qk, axis=0)    # softmax over s (== softmax of qk^T, dim=-1)
        w_sc[...] = jnp.dot(q, k.T, preferred_element_type=jnp.float32)      # (s, s)

    # ---- token slab (bblk*s, d): bf16 view for MXU, f32 view for residual ----
    x_slab_c = x_ref[...].reshape(bblk * s, d)
    x_slab = x_slab_c.astype(jnp.float32)

    # ---- EmbeddedAttention: v = FC_V(x), attn = W @ v (batched over block) ----
    v = jnp.dot(x_slab_c.astype(_COMPUTE_DT), wv_ref[...],
                preferred_element_type=jnp.float32) + vecs_ref[1:2, :]        # (bblk*s, d)
    v3 = v.reshape(bblk, s, d).astype(_COMPUTE_DT)                            # (bblk, s, d)
    w_b = jnp.broadcast_to(w_sc[...].astype(_COMPUTE_DT)[None, :, :],
                           (bblk, s, s))
    attn = jnp.einsum('bij,bjd->bid', w_b, v3,
                      preferred_element_type=jnp.float32)                     # (bblk, s, d)
    attn = attn.reshape(bblk * s, d)

    # ---- residual + LayerNorm 1 (f32) ----
    h1 = _layernorm(x_slab + attn, vecs_ref[3:4, :], vecs_ref[4:5, :])

    # ---- feed-forward (bf16 operands, f32 accumulate) ----
    ffv = jnp.dot(h1.astype(_COMPUTE_DT), w1_ref[...],
                  preferred_element_type=jnp.float32) + b1_ref[...]
    ffv = jnp.maximum(ffv, 0.0)
    ffv = jnp.dot(ffv.astype(_COMPUTE_DT), w2_ref[...],
                  preferred_element_type=jnp.float32) + vecs_ref[2:3, :]

    # ---- residual + LayerNorm 2 ----
    out = _layernorm(h1 + ffv, vecs_ref[5:6, :], vecs_ref[6:7, :])
    o_ref[...] = out.reshape(bblk, s, d).astype(o_ref.dtype)


# -------------------------------- wrapper ----------------------------------

def _vmem_limit_bytes():
    """Per-chip VMEM budget: <= 3/4 of physical, capped at 96 MiB.

    Falls back to a v7x-safe 64 MiB assumption if the query is unavailable,
    so the limit is always valid on v5e/v6e (128 MiB) and v7x (64 MiB).
    """
    phys = 64 * 1024 * 1024
    try:
        info = pltpu.get_tpu_info()
        cap = getattr(info, "vmem_capacity_bytes", None)
        if cap:
            phys = int(cap)
    except Exception:
        pass
    return max(32 * 1024 * 1024, min(phys * 3 // 4, 96 * 1024 * 1024))


def embedded_attention_layer(x, emb, params, dim=-2, block_b=None,
                             io_dtype=_IO_DT):
    """x: (b, n, s, d), emb: (n, s, e). Returns same shape/dtype as x."""
    orig_dtype = x.dtype
    x = jnp.swapaxes(x, dim, -2)              # glue (no-op for dim=-2)
    b, n, s, d = x.shape
    e = emb.shape[-1]
    ff = params["w1"].shape[0]

    vmem_limit = _vmem_limit_bytes()

    # --- batch block sizing: VMEM-budgeted, targets >= 512-row slabs, and the
    # batch is padded so block_b never collapses to 1 for prime/awkward b. ---
    if block_b is None:
        # rough per-batch-element VMEM bytes: f32 intermediates (x, v, attn,
        # h1, ff, out) + double-buffered bf16 in/out blocks + broadcast W.
        per_elem = s * (4 * (6 * d + ff) + 4 * d + 2 * s) + 1
        cap = max(1, (vmem_limit // 2) // per_elem)
        row_target = max(1, -(-512 // s))
        desired = max(1, min(cap, row_target, b))
    else:
        desired = max(1, min(block_b, b))
    nb = -(-b // desired)
    block_b = -(-b // nb)
    b_pad = nb * block_b

    x_in = x.astype(io_dtype)
    if b_pad != b:
        x_in = jnp.pad(x_in, ((0, b_pad - b), (0, 0), (0, 0), (0, 0)))

    # PyTorch Linear stores (out, in); pre-transpose + cast weights to bf16
    # so the kernel feeds the MXU at native rate with f32 accumulation.
    wqk_t = params["wqk"].T.astype(_COMPUTE_DT)   # (e, d)
    wv_t = params["wv"].T.astype(_COMPUTE_DT)     # (d, d)
    w1_t = params["w1"].T.astype(_COMPUTE_DT)     # (d, ff)
    w2_t = params["w2"].T.astype(_COMPUTE_DT)     # (ff, d)
    emb_c = emb.astype(_COMPUTE_DT)

    # Pack the 7 per-feature vectors (biases / LN params) into one (8, d) block.
    vecs = jnp.zeros((8, d), jnp.float32)
    vecs = vecs.at[:7].set(jnp.stack([
        params["bqk"], params["bv"], params["b2"],
        params["g1"], params["be1"], params["g2"], params["be2"],
    ]).astype(jnp.float32))
    b1 = params["b1"].astype(jnp.float32).reshape(1, ff)

    def const_spec(shape):
        return pl.BlockSpec(shape, lambda ni, bi: (0,) * len(shape))

    out = pl.pallas_call(
        _ealayer_kernel,
        out_shape=jax.ShapeDtypeStruct((b_pad, n, s, d), io_dtype),
        grid=(n, nb),
        in_specs=[
            pl.BlockSpec((block_b, None, s, d), lambda ni, bi: (bi, ni, 0, 0)),  # x
            pl.BlockSpec((None, s, e), lambda ni, bi: (ni, 0, 0)),               # emb
            const_spec((e, d)),      # FC_Q_K weight
            const_spec((d, d)),      # FC_V weight
            const_spec((d, ff)),     # feed_forward[0] weight
            const_spec((ff, d)),     # feed_forward[2] weight
            const_spec((8, d)),      # packed bias / LN vectors
            const_spec((1, ff)),     # feed_forward[0] bias
        ],
        out_specs=pl.BlockSpec((block_b, None, s, d), lambda ni, bi: (bi, ni, 0, 0)),
        scratch_shapes=[
            pltpu.VMEM((s, s), jnp.float32),   # cached (s, s) mixing matrix W
        ],
        compiler_params=pltpu.CompilerParams(
            dimension_semantics=("parallel", "arbitrary"),
            vmem_limit_bytes=vmem_limit),
    )(x_in, emb_c, wqk_t, wv_t, w1_t, w2_t, vecs, b1)

    out = out[:b].astype(orig_dtype)
    return jnp.swapaxes(out, dim, -2)


# --------------------------- pure-JAX reference -----------------------------

def reference(x, emb, params, dim=-2):
    x = jnp.swapaxes(x, dim, -2)
    qk = emb @ params["wqk"].T + params["bqk"]              # (n, s, d)
    q = jax.nn.softmax(qk, axis=-1)                         # (n, s, d)
    k = jax.nn.softmax(jnp.swapaxes(qk, -1, -2), axis=-1)   # (n, d, s)
    v = x @ params["wv"].T + params["bv"]                   # (b, n, s, d)
    out = jnp.einsum("nds,bnsk->bndk", k, v)
    out = jnp.einsum("nsd,bndk->bnsk", q, out)
    h1 = _layernorm(x + out, params["g1"], params["be1"])
    ffv = jnp.maximum(h1 @ params["w1"].T + params["b1"], 0.0)
    ffv = ffv @ params["w2"].T + params["b2"]
    out = _layernorm(h1 + ffv, params["g2"], params["be2"])
    return jnp.swapaxes(out, dim, -2)


# ----------------------------------- main -----------------------------------

if __name__ == "__main__":
    B, N, S = 2, 4, 8
    MODEL_DIM, NODE_EMB_DIM, FF_DIM = 32, 16, 64

    key = jax.random.PRNGKey(0)
    ks = jax.random.split(key, 12)

    x = jax.random.normal(ks[0], (B, N, S, MODEL_DIM), jnp.float32)
    emb = jax.random.normal(ks[1], (N, S, NODE_EMB_DIM), jnp.float32)

    params = {
        "wqk": 0.1 * jax.random.normal(ks[2], (MODEL_DIM, NODE_EMB_DIM), jnp.float32),
        "bqk": 0.1 * jax.random.normal(ks[3], (MODEL_DIM,), jnp.float32),
        "wv": 0.1 * jax.random.normal(ks[4], (MODEL_DIM, MODEL_DIM), jnp.float32),
        "bv": 0.1 * jax.random.normal(ks[5], (MODEL_DIM,), jnp.float32),
        "w1": 0.1 * jax.random.normal(ks[6], (FF_DIM, MODEL_DIM), jnp.float32),
        "b1": 0.1 * jax.random.normal(ks[7], (FF_DIM,), jnp.float32),
        "w2": 0.1 * jax.random.normal(ks[8], (MODEL_DIM, FF_DIM), jnp.float32),
        "b2": 0.1 * jax.random.normal(ks[9], (MODEL_DIM,), jnp.float32),
        "g1": jnp.ones((MODEL_DIM,), jnp.float32),
        "be1": jnp.zeros((MODEL_DIM,), jnp.float32),
        "g2": 1.0 + 0.1 * jax.random.normal(ks[10], (MODEL_DIM,), jnp.float32),
        "be2": 0.1 * jax.random.normal(ks[11], (MODEL_DIM,), jnp.float32),
    }

    out = embedded_attention_layer(x, emb, params, dim=-2)
    out = jax.block_until_ready(out)

    # Compare against the f32 reference evaluated on the same bf16-quantized x
    # (the kernel reads x from HBM in bf16); matmuls use bf16 operands with f32
    # accumulation and softmax uses an approx reciprocal -> relaxed tolerance.
    x_q = x.astype(jnp.bfloat16).astype(jnp.float32)
    ref = reference(x_q, emb, params, dim=-2)
    assert out.shape == x.shape
    assert jnp.allclose(out, ref, atol=4e-2, rtol=4e-2), "mismatch vs reference"

    print("KERNEL_OK")
</pallas_src>

<mosaic_0001>
module attributes {stable_mosaic.version = 11 : i64} {
  func.func @_ealayer_kernel(%arg0: i32, %arg1: i32, %arg2: memref<2x1x8x32xbf16, #tpu.memory_space<vmem>>, %arg3: memref<1x8x16xbf16, #tpu.memory_space<vmem>>, %arg4: memref<16x32xbf16, #tpu.memory_space<vmem>>, %arg5: memref<32x32xbf16, #tpu.memory_space<vmem>>, %arg6: memref<32x64xbf16, #tpu.memory_space<vmem>>, %arg7: memref<64x32xbf16, #tpu.memory_space<vmem>>, %arg8: memref<8x32xf32, #tpu.memory_space<vmem>>, %arg9: memref<1x64xf32, #tpu.memory_space<vmem>>, %arg10: memref<2x1x8x32xbf16, #tpu.memory_space<vmem>>, %arg11: memref<8x8xf32, #tpu.memory_space<vmem>>) attributes {dimension_semantics = [#tpu.dimension_semantics<parallel>, #tpu.dimension_semantics<arbitrary>], iteration_bounds = array<i64: 4, 1>, scalar_prefetch = 0 : i64, scratch_operands = 1 : i64, tpu.core_type = #tpu.core_type<tc>, window_params = [{transform_indices = @transform_0, window_bounds = array<i64: 2, 1, 8, 32>}, {transform_indices = @transform_1, window_bounds = array<i64: 1, 8, 16>}, {pipeline_mode = #tpu.pipeline_mode<synchronous>, transform_indices = @transform_2, window_bounds = array<i64: 16, 32>}, {pipeline_mode = #tpu.pipeline_mode<synchronous>, transform_indices = @transform_3, window_bounds = array<i64: 32, 32>}, {pipeline_mode = #tpu.pipeline_mode<synchronous>, transform_indices = @transform_4, window_bounds = array<i64: 32, 64>}, {pipeline_mode = #tpu.pipeline_mode<synchronous>, transform_indices = @transform_5, window_bounds = array<i64: 64, 32>}, {pipeline_mode = #tpu.pipeline_mode<synchronous>, transform_indices = @transform_6, window_bounds = array<i64: 8, 32>}, {pipeline_mode = #tpu.pipeline_mode<synchronous>, transform_indices = @transform_7, window_bounds = array<i64: 1, 64>}, {transform_indices = @transform_8, window_bounds = array<i64: 2, 1, 8, 32>}]} {
    %c0_i32 = arith.constant 0 : i32
    %0 = arith.cmpi eq, %arg1, %c0_i32 : i32
    %1 = arith.extui %0 : i1 to i32
    %c0_i32_0 = arith.constant 0 : i32
    %2 = arith.cmpi ne, %1, %c0_i32_0 : i32
    scf.if %2 {
      %c0_38 = arith.constant 0 : index
      %c0_39 = arith.constant 0 : index
      %c0_40 = arith.constant 0 : index
      %86 = vector.load %arg3[%c0_38, %c0_39, %c0_40] : memref<1x8x16xbf16, #tpu.memory_space<vmem>>, vector<1x8x16xbf16>
      %87 = vector.shape_cast %86 : vector<1x8x16xbf16> to vector<8x16xbf16>
      %c0_41 = arith.constant 0 : index
      %c0_42 = arith.constant 0 : index
      %88 = vector.load %arg4[%c0_41, %c0_42] : memref<16x32xbf16, #tpu.memory_space<vmem>>, vector<16x32xbf16>
      %cst_43 = arith.constant dense<0.000000e+00> : vector<8x32xf32>
      %89 = tpu.matmul %87, %88, %cst_43 {dimension_numbers = #tpu.dot_dimension_numbers<[1], [0], [0], [1], [0, 0, 1, 1], [], []>} : vector<8x16xbf16>, vector<16x32xbf16>, vector<8x32xf32> -> vector<8x32xf32>
      %c0_44 = arith.constant 0 : index
      %c0_45 = arith.constant 0 : index
      %90 = vector.load %arg8[%c0_44, %c0_45] : memref<8x32xf32, #tpu.memory_space<vmem>>, vector<1x32xf32>
      %91 = vector.broadcast %90 : vector<1x32xf32> to vector<8x32xf32>
      %92 = arith.addf %89, %91 : vector<8x32xf32>
      %cst_46 = arith.constant dense<0xFF800000> : vector<8xf32>
      %93 = vector.multi_reduction <maximumf>, %92, %cst_46 [1] : vector<8x32xf32> to vector<8xf32>
      %94 = vector.shape_cast %93 : vector<8xf32> to vector<8x1xf32>
      %95 = vector.broadcast %94 : vector<8x1xf32> to vector<8x32xf32>
      %96 = arith.subf %92, %95 : vector<8x32xf32>
      %97 = math.exp %96 : vector<8x32xf32>
      %cst_47 = arith.constant dense<0.000000e+00> : vector<8xf32>
      %98 = vector.multi_reduction <add>, %97, %cst_47 [1] : vector<8x32xf32> to vector<8xf32>
      %99 = vector.shape_cast %98 : vector<8xf32> to vector<8x1xf32>
      %100 = tpu.reciprocal %99 {approx = true} : vector<8x1xf32> -> vector<8x1xf32>
      %101 = vector.broadcast %100 : vector<8x1xf32> to vector<8x32xf32>
      %102 = arith.mulf %97, %101 : vector<8x32xf32>
      %cst_48 = arith.constant dense<0xFF800000> : vector<32xf32>
      %103 = vector.multi_reduction <maximumf>, %92, %cst_48 [0] : vector<8x32xf32> to vector<32xf32>
      %104 = vector.shape_cast %103 : vector<32xf32> to vector<1x32xf32>
      %105 = vector.broadcast %104 : vector<1x32xf32> to vector<8x32xf32>
      %106 = arith.subf %92, %105 : vector<8x32xf32>
      %107 = math.exp %106 : vector<8x32xf32>
      %cst_49 = arith.constant dense<0.000000e+00> : vector<32xf32>
      %108 = vector.multi_reduction <add>, %107, %cst_49 [0] : vector<8x32xf32> to vector<32xf32>
      %109 = vector.shape_cast %108 : vector<32xf32> to vector<1x32xf32>
      %110 = tpu.reciprocal %109 {approx = true} : vector<1x32xf32> -> vector<1x32xf32>
      %111 = vector.broadcast %110 : vector<1x32xf32> to vector<8x32xf32>
      %112 = arith.mulf %107, %111 : vector<8x32xf32>
      %113 = tpu.transpose %112, [1, 0] : vector<8x32xf32> -> vector<32x8xf32>
      %cst_50 = arith.constant dense<0.000000e+00> : vector<8x8xf32>
      %114 = tpu.matmul %102, %113, %cst_50 {dimension_numbers = #tpu.dot_dimension_numbers<[1], [0], [0], [1], [0, 0, 1, 1], [], []>} : vector<8x32xf32>, vector<32x8xf32>, vector<8x8xf32> -> vector<8x8xf32>
      %c0_51 = arith.constant 0 : index
      %c0_52 = arith.constant 0 : index
      %115 = vector.load %arg11[%c0_51, %c0_52] : memref<8x8xf32, #tpu.memory_space<vmem>>, vector<8x8xf32>
      tpu.vector_store %arg11[%c0_51, %c0_52], %114 {strides = array<i32>} : memref<8x8xf32, #tpu.memory_space<vmem>>, vector<8x8xf32>,
    } else {
    }
    %c0 = arith.constant 0 : index
    %c0_1 = arith.constant 0 : index
    %c0_2 = arith.constant 0 : index
    %c0_3 = arith.constant 0 : index
    %3 = vector.load %arg2[%c0, %c0_1, %c0_2, %c0_3] : memref<2x1x8x32xbf16, #tpu.memory_space<vmem>>, vector<2x1x8x32xbf16>
    %4 = vector.shape_cast %3 : vector<2x1x8x32xbf16> to vector<2x8x32xbf16>
    %5 = vector.shape_cast %4 : vector<2x8x32xbf16> to vector<16x32xbf16>
    %6 = arith.extf %5 : vector<16x32xbf16> to vector<16x32xf32>
    %c0_4 = arith.constant 0 : index
    %c0_5 = arith.constant 0 : index
    %7 = vector.load %arg5[%c0_4, %c0_5] : memref<32x32xbf16, #tpu.memory_space<vmem>>, vector<32x32xbf16>
    %cst = arith.constant dense<0.000000e+00> : vector<16x32xf32>
    %8 = tpu.matmul %5, %7, %cst {dimension_numbers = #tpu.dot_dimension_numbers<[1], [0], [0], [1], [0, 0, 1, 1], [], []>} : vector<16x32xbf16>, vector<32x32xbf16>, vector<16x32xf32> -> vector<16x32xf32>
    %c1 = arith.constant 1 : index
    %c0_6 = arith.constant 0 : index
    %9 = vector.load %arg8[%c1, %c0_6] : memref<8x32xf32, #tpu.memory_space<vmem>>, vector<1x32xf32>
    %10 = vector.broadcast %9 : vector<1x32xf32> to vector<16x32xf32>
    %11 = arith.addf %8, %10 : vector<16x32xf32>
    %12 = vector.shape_cast %11 : vector<16x32xf32> to vector<2x8x32xf32>
    %13 = arith.truncf %12 : vector<2x8x32xf32> to vector<2x8x32xbf16>
    %c0_7 = arith.constant 0 : index
    %c0_8 = arith.constant 0 : index
    %14 = vector.load %arg11[%c0_7, %c0_8] : memref<8x8xf32, #tpu.memory_space<vmem>>, vector<8x8xf32>
    %15 = arith.truncf %14 : vector<8x8xf32> to vector<8x8xbf16>
    %16 = vector.shape_cast %15 : vector<8x8xbf16> to vector<1x8x8xbf16>
    %17 = vector.shape_cast %16 : vector<1x8x8xbf16> to vector<1x8x8xbf16>
    %18 = vector.broadcast %17 : vector<1x8x8xbf16> to vector<2x8x8xbf16>
    "tpu.trace_start"() <{level = 10 : i32, message = "bij,bjd->bid"}> : () -> ()
    %cst_9 = arith.constant dense<0.000000e+00> : vector<2x8x32xf32>
    %19 = tpu.matmul %18, %13, %cst_9 {dimension_numbers = #tpu.dot_dimension_numbers<[2], [1], [1], [2], [0, 0, 0, 1, 1, 2], [0], [0]>} : vector<2x8x8xbf16>, vector<2x8x32xbf16>, vector<2x8x32xf32> -> vector<2x8x32xf32>
    "tpu.trace_stop"() : () -> ()
    %20 = vector.shape_cast %19 : vector<2x8x32xf32> to vector<16x32xf32>
    %21 = arith.addf %6, %20 : vector<16x32xf32>
    %c3 = arith.constant 3 : index
    %c0_10 = arith.constant 0 : index
    %22 = vector.load %arg8[%c3, %c0_10] : memref<8x32xf32, #tpu.memory_space<vmem>>, vector<1x32xf32>
    %c4 = arith.constant 4 : index
    %c0_11 = arith.constant 0 : index
    %23 = vector.load %arg8[%c4, %c0_11] : memref<8x32xf32, #tpu.memory_space<vmem>>, vector<1x32xf32>
    %cst_12 = arith.constant dense<0.000000e+00> : vector<16xf32>
    %24 = vector.multi_reduction <add>, %21, %cst_12 [1] : vector<16x32xf32> to vector<16xf32>
    %25 = vector.shape_cast %24 : vector<16xf32> to vector<16x1xf32>
    %cst_13 = arith.constant 3.200000e+01 : f32
    %26 = vector.broadcast %cst_13 : f32 to vector<16x1xf32>
    %27 = arith.divf %25, %26 : vector<16x1xf32>
    %28 = vector.broadcast %27 : vector<16x1xf32> to vector<16x32xf32>
    %29 = arith.subf %21, %28 : vector<16x32xf32>
    %30 = arith.mulf %29, %29 : vector<16x32xf32>
    %cst_14 = arith.constant dense<0.000000e+00> : vector<16xf32>
    %31 = vector.multi_reduction <add>, %30, %cst_14 [1] : vector<16x32xf32> to vector<16xf32>
    %32 = vector.shape_cast %31 : vector<16xf32> to vector<16x1xf32>
    %cst_15 = arith.constant 3.200000e+01 : f32
    %33 = vector.broadcast %cst_15 : f32 to vector<16x1xf32>
    %34 = arith.divf %32, %33 : vector<16x1xf32>
    %cst_16 = arith.constant 9.99999974E-6 : f32
    %35 = vector.broadcast %cst_16 : f32 to vector<16x1xf32>
    %36 = arith.addf %34, %35 : vector<16x1xf32>
    %37 = math.rsqrt %36 : vector<16x1xf32>
    %38 = vector.broadcast %37 : vector<16x1xf32> to vector<16x32xf32>
    %39 = arith.mulf %29, %38 : vector<16x32xf32>
    %40 = vector.broadcast %22 : vector<1x32xf32> to vector<16x32xf32>
    %41 = arith.mulf %39, %40 : vector<16x32xf32>
    %42 = vector.broadcast %23 : vector<1x32xf32> to vector<16x32xf32>
    %43 = arith.addf %41, %42 : vector<16x32xf32>
    %44 = arith.truncf %43 : vector<16x32xf32> to vector<16x32xbf16>
    %c0_17 = arith.constant 0 : index
    %c0_18 = arith.constant 0 : index
    %45 = vector.load %arg6[%c0_17, %c0_18] : memref<32x64xbf16, #tpu.memory_space<vmem>>, vector<32x64xbf16>
    %cst_19 = arith.constant dense<0.000000e+00> : vector<16x64xf32>
    %46 = tpu.matmul %44, %45, %cst_19 {dimension_numbers = #tpu.dot_dimension_numbers<[1], [0], [0], [1], [0, 0, 1, 1], [], []>} : vector<16x32xbf16>, vector<32x64xbf16>, vector<16x64xf32> -> vector<16x64xf32>
    %c0_20 = arith.constant 0 : index
    %c0_21 = arith.constant 0 : index
    %47 = vector.load %arg9[%c0_20, %c0_21] : memref<1x64xf32, #tpu.memory_space<vmem>>, vector<1x64xf32>
    %48 = vector.broadcast %47 : vector<1x64xf32> to vector<16x64xf32>
    %49 = arith.addf %46, %48 : vector<16x64xf32>
    %cst_22 = arith.constant 0.000000e+00 : f32
    %50 = vector.broadcast %cst_22 : f32 to vector<16x64xf32>
    %51 = arith.maximumf %49, %50 : vector<16x64xf32>
    %52 = arith.truncf %51 : vector<16x64xf32> to vector<16x64xbf16>
    %c0_23 = arith.constant 0 : index
    %c0_24 = arith.constant 0 : index
    %53 = vector.load %arg7[%c0_23, %c0_24] : memref<64x32xbf16, #tpu.memory_space<vmem>>, vector<64x32xbf16>
    %cst_25 = arith.constant dense<0.000000e+00> : vector<16x32xf32>
    %54 = tpu.matmul %52, %53, %cst_25 {dimension_numbers = #tpu.dot_dimension_numbers<[1], [0], [0], [1], [0, 0, 1, 1], [], []>} : vector<16x64xbf16>, vector<64x32xbf16>, vector<16x32xf32> -> vector<16x32xf32>
    %c2 = arith.constant 2 : index
    %c0_26 = arith.constant 0 : index
    %55 = vector.load %arg8[%c2, %c0_26] : memref<8x32xf32, #tpu.memory_space<vmem>>, vector<1x32xf32>
    %56 = vector.broadcast %55 : vector<1x32xf32> to vector<16x32xf32>
    %57 = arith.addf %54, %56 : vector<16x32xf32>
    %58 = arith.addf %43, %57 : vector<16x32xf32>
    %c5 = arith.constant 5 : index
    %c0_27 = arith.constant 0 : index
    %59 = vector.load %arg8[%c5, %c0_27] : memref<8x32xf32, #tpu.memory_space<vmem>>, vector<1x32xf32>
    %c6 = arith.constant 6 : index
    %c0_28 = arith.constant 0 : index
    %60 = vector.load %arg8[%c6, %c0_28] : memref<8x32xf32, #tpu.memory_space<vmem>>, vector<1x32xf32>
    %cst_29 = arith.constant dense<0.000000e+00> : vector<16xf32>
    %61 = vector.multi_reduction <add>, %58, %cst_29 [1] : vector<16x32xf32> to vector<16xf32>
    %62 = vector.shape_cast %61 : vector<16xf32> to vector<16x1xf32>
    %cst_30 = arith.constant 3.200000e+01 : f32
    %63 = vector.broadcast %cst_30 : f32 to vector<16x1xf32>
    %64 = arith.divf %62, %63 : vector<16x1xf32>
    %65 = vector.broadcast %64 : vector<16x1xf32> to vector<16x32xf32>
    %66 = arith.subf %58, %65 : vector<16x32xf32>
    %67 = arith.mulf %66, %66 : vector<16x32xf32>
    %cst_31 = arith.constant dense<0.000000e+00> : vector<16xf32>
    %68 = vector.multi_reduction <add>, %67, %cst_31 [1] : vector<16x32xf32> to vector<16xf32>
    %69 = vector.shape_cast %68 : vector<16xf32> to vector<16x1xf32>
    %cst_32 = arith.constant 3.200000e+01 : f32
    %70 = vector.broadcast %cst_32 : f32 to vector<16x1xf32>
    %71 = arith.divf %69, %70 : vector<16x1xf32>
    %cst_33 = arith.constant 9.99999974E-6 : f32
    %72 = vector.broadcast %cst_33 : f32 to vector<16x1xf32>
    %73 = arith.addf %71, %72 : vector<16x1xf32>
    %74 = math.rsqrt %73 : vector<16x1xf32>
    %75 = vector.broadcast %74 : vector<16x1xf32> to vector<16x32xf32>
    %76 = arith.mulf %66, %75 : vector<16x32xf32>
    %77 = vector.broadcast %59 : vector<1x32xf32> to vector<16x32xf32>
    %78 = arith.mulf %76, %77 : vector<16x32xf32>
    %79 = vector.broadcast %60 : vector<1x32xf32> to vector<16x32xf32>
    %80 = arith.addf %78, %79 : vector<16x32xf32>
    %81 = vector.shape_cast %80 : vector<16x32xf32> to vector<2x8x32xf32>
    %82 = arith.truncf %81 : vector<2x8x32xf32> to vector<2x8x32xbf16>
    %c0_34 = arith.constant 0 : index
    %c0_35 = arith.constant 0 : index
    %c0_36 = arith.constant 0 : index
    %c0_37 = arith.constant 0 : index
    %83 = vector.load %arg10[%c0_34, %c0_35, %c0_36, %c0_37] : memref<2x1x8x32xbf16, #tpu.memory_space<vmem>>, vector<2x1x8x32xbf16>
    %84 = vector.shape_cast %83 : vector<2x1x8x32xbf16> to vector<2x8x32xbf16>
    %85 = vector.shape_cast %82 : vector<2x8x32xbf16> to vector<2x1x8x32xbf16>
    tpu.vector_store %arg10[%c0_34, %c0_35, %c0_36, %c0_37], %85 {strides = array<i32>} : memref<2x1x8x32xbf16, #tpu.memory_space<vmem>>, vector<2x1x8x32xbf16>,
    return
  }
  func.func @transform_0(%arg0: i32, %arg1: i32) -> (i32, i32, i32, i32) {
    %c0_i32 = arith.constant 0 : i32
    %c0_i32_0 = arith.constant 0 : i32
    %c0_i32_1 = arith.constant 0 : i32
    return %arg1, %arg0, %c0_i32, %c0_i32_0 : i32, i32, i32, i32
  }
  func.func @transform_1(%arg0: i32, %arg1: i32) -> (i32, i32, i32) {
    %c0_i32 = arith.constant 0 : i32
    %c0_i32_0 = arith.constant 0 : i32
    %c0_i32_1 = arith.constant 0 : i32
    return %arg0, %c0_i32, %c0_i32_0 : i32, i32, i32
  }
  func.func @transform_2(%arg0: i32, %arg1: i32) -> (i32, i32) {
    %c0_i32 = arith.constant 0 : i32
    %c0_i32_0 = arith.constant 0 : i32
    %c0_i32_1 = arith.constant 0 : i32
    return %c0_i32, %c0_i32_0 : i32, i32
  }
  func.func @transform_3(%arg0: i32, %arg1: i32) -> (i32, i32) {
    %c0_i32 = arith.constant 0 : i32
    %c0_i32_0 = arith.constant 0 : i32
    %c0_i32_1 = arith.constant 0 : i32
    return %c0_i32, %c0_i32_0 : i32, i32
  }
  func.func @transform_4(%arg0: i32, %arg1: i32) -> (i32, i32) {
    %c0_i32 = arith.constant 0 : i32
    %c0_i32_0 = arith.constant 0 : i32
    %c0_i32_1 = arith.constant 0 : i32
    return %c0_i32, %c0_i32_0 : i32, i32
  }
  func.func @transform_5(%arg0: i32, %arg1: i32) -> (i32, i32) {
    %c0_i32 = arith.constant 0 : i32
    %c0_i32_0 = arith.constant 0 : i32
    %c0_i32_1 = arith.constant 0 : i32
    return %c0_i32, %c0_i32_0 : i32, i32
  }
  func.func @transform_6(%arg0: i32, %arg1: i32) -> (i32, i32) {
    %c0_i32 = arith.constant 0 : i32
    %c0_i32_0 = arith.constant 0 : i32
    %c0_i32_1 = arith.constant 0 : i32
    return %c0_i32, %c0_i32_0 : i32, i32
  }
  func.func @transform_7(%arg0: i32, %arg1: i32) -> (i32, i32) {
    %c0_i32 = arith.constant 0 : i32
    %c0_i32_0 = arith.constant 0 : i32
    %c0_i32_1 = arith.constant 0 : i32
    return %c0_i32, %c0_i32_0 : i32, i32
  }
  func.func @transform_8(%arg0: i32, %arg1: i32) -> (i32, i32, i32, i32) {
    %c0_i32 = arith.constant 0 : i32
    %c0_i32_0 = arith.constant 0 : i32
    %c0_i32_1 = arith.constant 0 : i32
    return %arg1, %arg0, %c0_i32, %c0_i32_0 : i32, i32, i32, i32
  }
}

</mosaic_0001>

<bundles_post_ra>
// kernel: tpu_custom_call.1
= control target key start
LH: loop header
LB: loop body
LE: loop exit
PB: predicated region body
PF: predicated region fallthrough
CT: control target
= control target key end

     0   :  { %s2007_s0 = inlined_call_operand.vmem [shape: bf16[2,4,8,32], index: 0, kind: input, shape index: {}]   ;;  %s2008_s1 = inlined_call_operand.vmem [shape: bf16[4,8,16], index: 1, kind: input, shape index: {}]   ;;  %s2009_s2 = inlined_call_operand.hbm [shape: bf16[16,32], index: 2, kind: input, shape index: {}]   ;;  %s2010_s3 = inlined_call_operand.hbm [shape: bf16[32,32], index: 3, kind: input, shape index: {}]   ;;  %s2011_s4 = inlined_call_operand.hbm [shape: bf16[32,64], index: 4, kind: input, shape index: {}]   ;;  %s2012_s5 = inlined_call_operand.vmem [shape: bf16[64,32], index: 5, kind: input, shape index: {}]   ;;  %s2013_s6 = inlined_call_operand.hbm [shape: f32[8,32], index: 6, kind: input, shape index: {}]   ;;  %s2014_s7 = inlined_call_operand.vmem [shape: f32[1,64], index: 7, kind: input, shape index: {}]   ;;  %s2015_s8 = inlined_call_operand.hbm [shape: bf16[2,4,8,32], index: 8, kind: output, shape index: {}]  }
   0x1   :  { %2026 = sst [smem:[#allocation22_spill]] %s2014_s7 }
   0x2   :  { %2027 = sst [smem:[#allocation23_spill]] %s2015_s8 }
   0x3   :  { %13 = vsyncpa [#allocation5], 0 }
   0x4   :  { %14 = vsyncpa [#allocation8], 0 }
   0x5   :  { %15 = vsyncpa [#allocation11], 0 }
   0x6   :  { %16 = vsyncpa [#allocation6], 0 }
   0x7   :  { %18 = vsyncpa [#allocation6 + $0x1], 0  ;;  %s1686_s27 = smov 0   ;;  %s1688_s28 = smov 0  }
   0x8   :  { %s1690_s29 = smov 0   ;;  %s1692_s30 = smov 0  }
   0x9   :  { %s1694_s9 = smov 0   ;;  %s1696_s10 = smov 0  }
   0xa LB: > { %2028 = sst [smem:[#allocation17_spill]] %s1607_s27  ;;  %s1177_s11 = sadd.s32 4294967295, %s1627_s10   ;;  %s1627_s10 = sphi %s1696_s10, %s24_s10   ;;  %s1623_s9 = sphi %s1694_s9, %s2056_s9   ;;  %s1619_s30 = sphi %s1692_s30, %s2055_s30   ;;  %s1615_s29 = sphi %s1690_s29, %s2054_s29   ;;  %s1611_s28 = sphi %s1688_s28, %s2053_s28   ;;  %s1607_s27 = sphi %s1686_s27, %s2052_s27  }
   0xb   : > { %s1178_s12 = sadd.s32 4294967294, %s1627_s10   ;;  %s36_s13 = sadd.s32 1, %s1623_s9 }
   0xc   : > { %s45_s14 = sadd.s32 1, %s1615_s29  ;;  %p38_p0 = scmp.ge.s32.totalorder %s36_s13, 4 }
   0xd   : > { %p52_p1 = scmp.ne.s32.totalorder %s1615_s29, %s1611_s28  ;;  %p53_p2 = scmp.eq.s32.totalorder %s1627_s10, 0 }
   0xe   : > { %p236_p3 = scmp.eq.s32.totalorder %s1177_s11, 3  ;;  %s2058_s13 = smov (%p38_p0, %s36_s13), 0 }
   0xf   : > { %2029 = sst [smem:[#allocation18_spill]] %s2058_s13  ;;  %p1725_p4 = por %p53_p2, %p52_p1 }
  0x10   : > { %p1729_p5 = por %p236_p3, %p52_p1  ;;  %s41_s17 = ssub.s32 %s1623_s9, %s2058_s13 }
  0x11   : > { %s2030_s15 = scalar_select %p1725_p4, 1, 0 }
  0x12   : > { %s2031_s16 = scalar_select %p1729_p5, 1, 0 }
  0x13   : > { %p241_p6 = scmp.ne.s32.totalorder %s1611_s28, %s1607_s27  ;;  %p43_p7 = scmp.eq.s32.totalorder %s41_s17, 0 }
  0x14   : > { %2032 = sst [smem:[#allocation19_spill]] %s2031_s16  ;;  %p242_p8 = scmp.eq.s32.totalorder %s1178_s12, 3 }
  0x15   : > { %p1179_p9 = scmp.ge.s32.totalorder %s1627_s10, 1  ;;  %p249_p10 = scmp.lt.s32.totalorder %s1627_s10, 5 }
  0x16   : > { %s1740_s18 = scalar_select %p43_p7, %s1615_s29, %s45_s14  }
  0x17   : > { %p1742_p11 = por %p242_p8, %p241_p6  ;;  %p1746_p12 = pnand %p1179_p9, %p249_p10 }
  0x18   : > { %2033 = sst [smem:[#allocation20_spill]] %s1740_s18  ;;  %p1750_p13 = scmp.eq.s32.totalorder %s1177_s11, 0 }
  0x19   : > { %s2034_s19 = scalar_select %p1742_p11, 1, 0 }
  0x1a   : > { %s2036_s20 = scalar_select %p1746_p12, 1, 0 }
  0x1b   : > { %2035 = sst [smem:[#allocation21_spill]] %s2034_s19  ;;  %p1313_p0 = pneg %p1746_p12 }
  0x1c   : > { %s2037_s21 = scalar_select %p1750_p13, 1, 0 }
  0x1d   : > { %p1758_p1 = pnand %p1750_p13, %p1313_p0  ;;  %s1629_s23 = smov [#allocation7]  }
  0x1e   : > { %s274_s24 = sshll.u32 %s1629_s23, 4  ;;  %s1425_s12 = scalar_lea.hbm %s2010_s3, 256  ;;  %s275_s24 = int_to_ptr.vmem [resolvable:$true] %s274_s24 }
  0x1f   : > { %p1426_p2 = scmp.ne.s32.totalorder %s2010_s3, %s1425_s12  ;;  %p1770_p3 = pneg %p1758_p1 }
  0x20   : > { %p1432_p8 = scmp.lt.u32.totalorder %s1425_s12, %s2010_s3 }
  0x21   : > { %p1428_p6 = pnand %p1770_p3, %p1426_p2 }
  0x23   : > { %p1429_p7 = pneg %p1428_p6 }
  0x25   : > { %p1434_p9 = pnand %p1432_p8, %p1429_p7 }
  0x27   : > { %1437 = shalt.err (!%p1434_p9)
}
  0x28   : > { %s1438_s25 = scalar_lea.vmem %s275_s24, 256  ;;  %p1446_p5 = scmp.lt.s32.totalorder %s275_s24, %s275_s24 }
  0x29   : > { %p1439_p10 = scmp.ne.s32.totalorder %s275_s24, %s1438_s25  ;;  %p1447_p13 = scmp.lt.s32.totalorder %s1438_s25, %s1438_s25 }
  0x2b   : > { %p1441_p0 = pnand %p1439_p10, %p1770_p3  ;;  %p1448_p12 = por %p1447_p13, %p1446_p5 }
  0x2d   : > { %p1442_p11 = pneg %p1441_p0 }
  0x2f   : > { %p1449_p4 = pnand %p1448_p12, %p1442_p11 }
  0x31   : > { %1452 = shalt.err (!%p1449_p4)
}
  0x32   : > { %s1630_s26 = smov 64   ;;  %s1631_s11 = smov 4  }
  0x33   : > { %1319 = dma.hbm_to_vmem [thread:$0]  (!%p1758_p1), %s2010_s3, 256, %s275_s24, [#allocation8], %s1630_s26, %s1630_s26, %s1631_s11  }
  0x34   : > { %s1632_s14 = smov [#allocation4]   ;;  %s1633_s18 = smov [#allocation9]  }
  0x35   : > { %s261_s23 = sshll.u32 %s1632_s14, 4  ;;  %s287_s19 = sshll.u32 %s1633_s18, 4  ;;  %s262_s23 = int_to_ptr.vmem [resolvable:$true] %s261_s23  ;;  %s1789_s19 = int_to_ptr.vmem [resolvable:$true] %s287_s19 }
  0x36   : > { %s1453_s8 = scalar_lea.hbm %s2009_s2, 128 }
  0x37   : > { %p1454_p4 = scmp.ne.s32.totalorder %s2009_s2, %s1453_s8  ;;  %p1460_p12 = scmp.lt.u32.totalorder %s1453_s8, %s2009_s2 }
  0x39   : > { %p1456_p5 = pnand %p1454_p4, %p1770_p3 }
  0x3b   : > { %p1457_p11 = pneg %p1456_p5 }
  0x3d   : > { %p1462_p13 = pnand %p1460_p12, %p1457_p11 }
  0x3f   : > { %1465 = shalt.err (!%p1462_p13)
}
  0x40   : > { %s1466_s18 = scalar_lea.vmem %s262_s23, 128  ;;  %p1474_p8 = scmp.lt.s32.totalorder %s262_s23, %s262_s23 }
  0x41   : > { %p1467_p2 = scmp.ne.s32.totalorder %s262_s23, %s1466_s18  ;;  %p1475_p9 = scmp.lt.s32.totalorder %s1466_s18, %s1466_s18 }
  0x43   : > { %p1469_p6 = pnand %p1467_p2, %p1770_p3  ;;  %p1476_p10 = por %p1475_p9, %p1474_p8 }
  0x45   : > { %p1470_p7 = pneg %p1469_p6 }
  0x47   : > { %p1477_p0 = pnand %p1476_p10, %p1470_p7 }
  0x49   : > { %1480 = shalt.err (!%p1477_p0)
}
  0x4a   : > { %1316 = dma.hbm_to_vmem [thread:$0]  (!%p1758_p1), %s2009_s2, 128, %s262_s23, [#allocation5], %s1630_s26, %s1630_s26, %s1631_s11  }
  0x4b   : > { %s1481_s12 = scalar_lea.hbm %s2011_s4, 256 }
  0x4c   : > { %p1482_p4 = scmp.ne.s32.totalorder %s2011_s4, %s1481_s12  ;;  %p1488_p12 = scmp.lt.u32.totalorder %s1481_s12, %s2011_s4 }
  0x4e   : > { %p1484_p5 = pnand %p1482_p4, %p1770_p3 }
  0x50   : > { %p1485_p11 = pneg %p1484_p5 }
  0x52   : > { %p1490_p13 = pnand %p1488_p12, %p1485_p11 }
  0x54   : > { %1493 = shalt.err (!%p1490_p13)
}
  0x55   : > { %s1494_s23 = scalar_lea.vmem %s1789_s19, 256  ;;  %p1502_p8 = scmp.lt.s32.totalorder %s1789_s19, %s1789_s19 }
  0x56   : > { %p1495_p2 = scmp.ne.s32.totalorder %s1789_s19, %s1494_s23  ;;  %p1503_p9 = scmp.lt.s32.totalorder %s1494_s23, %s1494_s23 }
  0x58   : > { %p1497_p6 = pnand %p1495_p2, %p1770_p3  ;;  %p1504_p10 = por %p1503_p9, %p1502_p8 }
  0x5a   : > { %p1498_p7 = pneg %p1497_p6 }
  0x5c   : > { %p1505_p0 = pnand %p1504_p10, %p1498_p7 }
  0x5e   : > { %1508 = shalt.err (!%p1505_p0)
}
  0x5f   : > { %1322 = dma.hbm_to_vmem [thread:$0]  (!%p1758_p1), %s2011_s4, 256, %s1789_s19, [#allocation8], %s1630_s26, %s1630_s26, %s1631_s11  }
  0x60   : > { %s1634_s8 = smov [#allocation10]   ;;  %s1509_s14 = scalar_lea.hbm %s2013_s6, 128 }
  0x61   : > { %s304_s27 = sshll.u32 %s1634_s8, 4  ;;  %p1510_p4 = scmp.ne.s32.totalorder %s2013_s6, %s1509_s14  ;;  %s305_s27 = int_to_ptr.vmem [resolvable:$true] %s304_s27 }
  0x62   : > { %p1516_p12 = scmp.lt.u32.totalorder %s1509_s14, %s2013_s6 }
  0x63   : > { %p1512_p5 = pnand %p1510_p4, %p1770_p3 }
  0x65   : > { %p1513_p11 = pneg %p1512_p5 }
  0x67   : > { %p1518_p13 = pnand %p1516_p12, %p1513_p11 }
  0x69   : > { %1521 = shalt.err (!%p1518_p13)
}
  0x6a   : > { %s1522_s19 = scalar_lea.vmem %s305_s27, 128  ;;  %p1530_p8 = scmp.lt.s32.totalorder %s305_s27, %s305_s27 }
  0x6b   : > { %p1523_p2 = scmp.ne.s32.totalorder %s305_s27, %s1522_s19  ;;  %p1531_p9 = scmp.lt.s32.totalorder %s1522_s19, %s1522_s19 }
  0x6d   : > { %p1525_p6 = pnand %p1523_p2, %p1770_p3  ;;  %p1532_p10 = por %p1531_p9, %p1530_p8 }
  0x6f   : > { %p1526_p7 = pneg %p1525_p6 }
  0x71   : > { %p1533_p0 = pnand %p1532_p10, %p1526_p7 }
  0x73   : > { %1536 = shalt.err (!%p1533_p0)
}
  0x74   : > { %1325 = dma.hbm_to_vmem [thread:$0]  (!%p1758_p1), %s2013_s6, 128, %s305_s27, [#allocation11]  }
  0x75   : > { %p1184_p4 = scmp.ge.s32.totalorder %s1627_s10, 4 }
  0x76   : > { %p2040_p5 = scmp.ne.s32.totalorder (!%p1184_p4), %s2030_s15, 0 }
  0x77   : > { %314 = sbr.rel (%p1184_p4) target bundleno = 133 (0x85), region = 40 }
  0x7e   : > { %317 = sbr.rel (!%p2040_p5) target bundleno = 133 (0x85), region = 44  ;;  %s319_s17 = sand.u32 (%p2040_p5), 1, %s1615_s29  }
  0x7f   : > { %s1186_s18 = sshll.u32 (%p2040_p5), %s1623_s9, 2  ;;  %s1185_s7 = sshll.u32 (%p2040_p5), %s319_s17, 3 }
  0x80   : > { %s326_s12 = scalar_lea.vmem (%p2040_p5), %s2007_s0, %s1186_s18  ;;  %s321_s22 = scalar_lea.vmem (%p2040_p5), [#allocation3], %s1185_s7 }
  0x81   : > { %v342_v0 = vld [vmem:[%s326_s12] sm:$0xf] (%p2040_p5)  ;;  %v344_v1 = vld [vmem:[%s326_s12 + $0x10] sm:$0xf] (%p2040_p5) }
  0x82   : > { %343 = vst [vmem:[%s321_s22] sm:$0xf] (%p2040_p5), %v342_v0  ;;  %345 = vst [vmem:[%s321_s22 + $0x4] sm:$0xf] (%p2040_p5), %v344_v1 }
  0x85 PF: > { %p2041_p1 = scmp.ne.s32.totalorder %s2036_s20, 0 }
  0x86   : > { %s385_s15 = sand.u32 (!%p2041_p1), 1, %s1611_s28   ;;  %p2042_p3 = scmp.ne.s32.totalorder (!%p2041_p1), %s2037_s21, 0 }
  0x87   : > { %382 = sbr.rel (%p2041_p1) target bundleno = 2216 (0x8a8), region = 89  ;;  %s1869_s27 = sshll.u32 (!%p2041_p1), %s385_s15, 3 }
  0x88   : > { %s387_s14 = scalar_lea.vmem (!%p2041_p1), [#allocation3], %s1869_s27 }
  0x8e   : > { %1590 = dma.done.wait (%p2042_p3), [#allocation5], 128  }
  0x8f   : > { %1592 = vsyncadd (%p2042_p3), [#allocation5], 4294967168 }
  0x90   : > { %1594 = dma.done.wait (%p2042_p3), [#allocation8], 512  }
  0x91   : > { %1596 = vsyncadd (%p2042_p3), [#allocation8], 4294966784 }
  0x92   : > { %1598 = dma.done.wait (%p2042_p3), [#allocation11], 128  }
  0x93   : > { %1600 = vsyncadd (%p2042_p3), [#allocation11], 4294967168  ;;  %p439_p11 = scmp.lt.s32.totalorder %s1619_s30, 3  ;;  %v1635_v2 = vmov 0.0   ;;  %vm1636_vm0 = vmmov 0   ;;  %v1398_v3 = vld [vmem:[#allocation4] sm:$0xff]  }
  0x94   : > { %1244 = vmatprep.subr.bf16.mxu0 %v1635_v2  ;;  %1246 = vmatprep.mubr.msk.bf16.mxu0 %vm1636_vm0, %v1635_v2  ;;  %vm463_vm1 = vcmask 130048   ;;  %v1195_v5 = vld [vmem:[#allocation10] ss:$0 sm:$0xff]  ;;  %vm507_vm2 = vcmask 261120   ;;  %v1400_v39 = vld [vmem:[#allocation7 + $0x8] sm:$0xff]   ;;  %vm613_vm3 = vcmask 64512  }
  0x95   : > { %s440_s20 = scalar_select %p439_p11, %s1619_s30, 3  ;;  %1263 = vmatprep.subr.bf16.mxu1 %v1635_v2  ;;  %1265 = vmatprep.mubr.msk.bf16.mxu1 %vm1636_vm0, %v1635_v2  ;;  %v1399_v37 = vld [vmem:[#allocation7] sm:$0xff]   ;;  %v615_v40 = vld [vmem:[%s387_s14] sm:$0xff]   ;;  %vm698_vm4 = vcmask 1043456   ;;  %vm936_vm5 = vcmask 523264   ;;  %vm1025_vm6 = vcmask 257024  }
  0x96   : > { %1245 = vmatpush3.bf16.msra.mxu0 %v1398_v3  ;;  %v1200_v43 = vld [vmem:[#allocation10 + $0x1] ss:$0 sm:$0xff]  ;;  %v617_v56 = vunpack.c.l.bf16 %v615_v40  ;;  %v618_v63 = vunpack.c.h.bf16 %v615_v40  ;;  %s2043_s22 = sld [smem:[#allocation22_spill]]  ;;  %s1222_s14 = sshll.u32 %s1619_s30, 6 }
  0x97   : > { %s1194_s25 = sshll.u32 %s440_s20, 2  ;;  %1250 = vmatprep.subr.mxu0 %v1635_v2  ;;  %s2044_s20 = sld [smem:[#allocation19_spill]] }
  0x98   : > { %s442_s24 = scalar_lea.vmem %s2008_s1, %s1194_s25  ;;  %s437_s25 = scalar_lea.vmem [#allocation12], %s1869_s27 }
  0x99   : > { %v449_v4 = vld [vmem:[%s442_s24] sm:$0xf]  ;;  %s1044_s13 = sshll.u32 %s437_s25, 4  ;;  %s2045_s23 = sld [smem:[#allocation23_spill]]  ;;  %s1957_s13 = int_to_ptr.vmem [resolvable:$true] %s1044_s13 }
  0x9a   : > { %1247 = vmatmul.mubr.msk.bf16.vlgmr.msra.gmra.mrb[0].mxu0 %vm463_vm1, %v449_v4  ;;  %s1961_s30 = scalar_lea.sflag [#allocation6], %s385_s15  ;;  %s1537_s27 = scalar_lea.vmem %s1957_s13, 128 }
  0x9b   : > { %1252 = vmatprep.mubr.msk.f32.mxu0 %vm1636_vm0, %v1635_v2  ;;  %p1538_p12 = scmp.ne.s32.totalorder %s1957_s13, %s1537_s27  ;;  %s1637_s26 = smov [#allocation12]  }
  0x9c   : > { %s1541_s11 = sshll.u32 %s1637_s26, 4  ;;  %s1542_s11 = int_to_ptr.vmem [resolvable:$false] %s1541_s11 }
  0x9d   : > { %p2046_p13 = scmp.ne.s32.totalorder %s2044_s20, 0  ;;  %s1543_s17 = scalar_lea.vmem %s1542_s11, 256 }
  0x9e   : > { %p1544_p7 = scmp.lt.s32.totalorder %s1957_s13, %s1542_s11  ;;  %p1545_p8 = scmp.lt.s32.totalorder %s1543_s17, %s1537_s27 }
  0x9f   : > { %s1955_s19 = scalar_lea.hbm %s2045_s23, %s1222_s14  ;;  %p1539_p2 = pnand %p1538_p12, %p2046_p13 }
  0xa0   : > { %p1546_p9 = por %p1545_p8, %p1544_p7 }
  0xa1   : > { %p1540_p6 = pneg %p1539_p2 }
  0xa3   : > { %p1547_p10 = pnand %p1546_p9, %p1540_p6 }
 0x16d   : > { %v501_v6 = vpop.f32.mrb[0].mxu0 }
 0x16e   : > { %v502_v7 = vadd.f32 %v1195_v5, %v501_v6  ;;  %v1248_v8 = vpop.f32.mrb[1].mxu0 }
 0x16f   : > { %v504_v9 = vpop.f32.mrb[2].mxu0 }
 0x170   : > { %v1249_v10 = vpop.f32.mrb[3].mxu0  ;;  %v508_v11 = vsel %vm507_vm2, %v502_v7, -inf }
 0x171   : > { %509 = vmax.xlane.f32.xlu0 %v508_v11  ;;  %v519_v12 = vrot.slane %v508_v11, 4 }
 0x173   : > { %v520_v13 = vmax.f32 %v508_v11, %v519_v12 }
 0x175   : > { %v521_v14 = vrot.slane %v520_v13, 2 }
 0x177   : > { %v522_v15 = vmax.f32 %v520_v13, %v521_v14 }
 0x179   : > { %v523_v16 = vrot.slane %v522_v15, 1 }
 0x17b   : > { %v524_v17 = vmax.f32 %v522_v15, %v523_v16 }
 0x17d   : > { %v525_v18 = vsub.f32 %v502_v7, %v524_v17  ;;  %v1402_v17 = vld [vmem:[#allocation9] sm:$0xff]  }
 0x17f   : > { %v526_v19 = vmul.f32 1.442695, %v525_v18  ;;  %v1403_v18 = vld [vmem:[#allocation9 + $0x8] sm:$0xff]  }
 0x181   : > { %1409 = vpow2.f32 %v526_v19  ;;  %v1404_v19 = vld [vmem:[%s2012_s5] sm:$0xff]  }
 0x18b   : > { %v1410_v20 = vpop.eup %1409 }
 0x18c   : > { %v528_v21 = vsel %vm507_vm2, %v1410_v20, 0.0 }
 0x18d   : > { %v529_v22 = vrot.slane %v528_v21, 4 }
 0x18f   : > { %v530_v23 = vadd.f32 %v529_v22, %v528_v21 }
 0x191   : > { %v531_v24 = vrot.slane %v530_v23, 2 }
 0x193   : > { %v532_v25 = vadd.f32 %v531_v24, %v530_v23 }
 0x195   : > { %v533_v26 = vrot.slane %v532_v25, 1 }
 0x197   : > { %v534_v27 = vadd.f32 %v533_v26, %v532_v25 }
 0x199   : > { %1411 = vrcp.f32 %v534_v27 }
 0x1a3   : > { %v1412_v28 = vpop.eup %1411 }
 0x1a4   : > { %v536_v29 = vmul.f32 %v1412_v28, %v1410_v20  ;;  %v1405_v20 = vld [vmem:[%s2012_s5 + $0x8] sm:$0xff]  }
 0x1a6   : > { %1251 = vmatpush3.xpose.msk.msra.mxu0 %vm507_vm2, %v536_v29  ;;  %v1207_v29 = vld [vmem:[#allocation10 + $0x3] ss:$0 sm:$0xff] }
 0x1a7   : > { %1255 = vmatprep.subr.bf16.mxu0 %v1635_v2 }
 0x1fe   : > { %v510_v30 = vpop.xlane.xlu0 %509 }
 0x1ff   : > { %v511_v31 = vsub.f32 %v502_v7, %v510_v30 }
 0x201   : > { %v512_v32 = vmul.f32 1.442695, %v511_v31 }
 0x203   : > { %1413 = vpow2.f32 %v512_v32 }
 0x20d   : > { %v1414_v33 = vpop.eup %1413 }
 0x20e   : > { %v514_v34 = vsel %vm507_vm2, %v1414_v33, 0.0 }
 0x20f   : > { %515 = vadd.xlane.f32.xlu0 %v514_v34 }
 0x29c   : > { %v516_v35 = vpop.xlane.xlu0 %515 }
 0x29d   : > { %1415 = vrcp.f32 %v516_v35 }
 0x2a7   : > { %v1416_v36 = vpop.eup %1415 }
 0x2a8   : > { %v518_v38 = vmul.f32 %v1416_v36, %v1414_v33  ;;  %v1208_v33 = vld [vmem:[#allocation10 + $0x4] ss:$0 sm:$0xff] }
 0x2aa   : > { %1253 = vmatmul.mubr.msk.f32.vlgmr.msra.gmra.mrb[4].mxu0 %vm507_vm2, %v518_v38  ;;  %v1406_v38 = vld [vmem:[%s2012_s5 + $0x10] sm:$0xff]  }
 0x2ab   : > { %1256 = vmatpush3.bf16.msra.mxu0 %v1399_v37  ;;  %1259 = vmatprep.mubr.msk.bf16.mxu0 %vm1636_vm0, %v1635_v2 }
 0x2ac   : > { %1257 = vmatprep.subr.bf16.mxu0 %v1635_v2 }
 0x2af   : > { %1258 = vmatpush3.bf16.msra.mxu0 %v1400_v39  ;;  %v1407_v39 = vld [vmem:[%s2012_s5 + $0x18] sm:$0xff]  }
 0x2b0   : > { %1275 = vmatprep.subr.bf16.mxu0 %v1635_v2 }
 0x2b2   : > { %1260 = vmatmul.mubr.msk.bf16.vlgmr.msra.gmra.mrb[8].mxu0 %vm507_vm2, %v615_v40  ;;  %v1209_v40 = vld [vmem:[%s2043_s22] ss:$0 sm:$0xff] }
 0x2b3   : > { %1279 = vmatprep.mubr.msk.bf16.mxu0 %vm1636_vm0, %v1635_v2  ;;  %1276 = vmatpush3.bf16.msra.mxu0 %v1402_v17  ;;  %v1220_v17 = vld [vmem:[#allocation10 + $0x6] ss:$0 sm:$0xff] }
 0x2b4   : > { %1277 = vmatprep.subr.bf16.mxu0 %v1635_v2 }
 0x2b7   : > { %1278 = vmatpush3.bf16.msra.mxu0 %v1403_v18 }
 0x37d   : > { %v609_v41 = vpop.f32.mrb[4].mxu0 }
 0x37e   : > { %614 = vst.msk [vmem:[#allocation2] sm:$0xff] %vm613_vm3, %v609_v41  ;;  %v1254_v42 = vpop.f32.mrb[5].mxu0 }
 0x385   : > { %v683_v44 = vpop.f32.mrb[8].mxu0  ;;  %v692_v51 = vld [vmem:[#allocation2] sm:$0xff] }
 0x386   : > { %v684_v45 = vadd.f32 %v1200_v43, %v683_v44  ;;  %v1261_v46 = vpop.f32.mrb[9].mxu0  ;;  %v693_v54 = vpack.c.bf16 %v692_v51, %v692_v51 }
 0x387   : > { %v686_v47 = vpop.f32.mrb[10].mxu0 }
 0x388   : > { %v690_v48 = vpack.c.bf16 %v684_v45, %v684_v45  ;;  %v687_v49 = vadd.f32 %v1200_v43, %v686_v47  ;;  %v1262_v50 = vpop.f32.mrb[11].mxu0 }
 0x38a   : > { %v691_v52 = vpack.c.bf16 %v687_v49, %v687_v49  ;;  %v700_v53 = vsel %vm698_vm4, %v690_v48, 0 }
 0x38b   : > { %1264 = vmatpush3.bf16.msra.mxu1 %v700_v53 }
 0x38c   : > { %1269 = vmatprep.subr.bf16.mxu1 %v1635_v2  ;;  %v743_v55 = vsel %vm698_vm4, %v691_v52, 0 }
 0x38e   : > { %1266 = vmatmul.mubr.msk.bf16.vlgmr.msra.gmra.mrb[0].mxu1 %vm613_vm3, %v693_v54 }
 0x38f   : > { %1270 = vmatpush3.bf16.msra.mxu1 %v743_v55  ;;  %1271 = vmatprep.mubr.msk.bf16.mxu1 %vm1636_vm0, %v1635_v2 }
 0x390   : > { %1283 = vmatprep.subr.bf16.mxu1 %v1635_v2 }
 0x396   : > { %1272 = vmatmul.mubr.msk.bf16.vlgmr.msra.gmra.mrb[4].mxu1 %vm613_vm3, %v693_v54 }
 0x397   : > { %1291 = vmatprep.mubr.msk.bf16.mxu1 %vm1636_vm0, %v1635_v2  ;;  %1284 = vmatpush3.bf16.msra.mxu1 %v1404_v19 }
 0x398   : > { %1285 = vmatprep.subr.bf16.mxu1 %v1635_v2 }
 0x39b   : > { %1286 = vmatpush3.bf16.msra.mxu1 %v1405_v20 }
 0x39c   : > { %1287 = vmatprep.subr.bf16.mxu1 %v1635_v2 }
 0x39f   : > { %1288 = vmatpush3.bf16.msra.mxu1 %v1406_v38 }
 0x3a0   : > { %1289 = vmatprep.subr.bf16.mxu1 %v1635_v2  ;;  %v1213_v2 = vld [vmem:[#allocation10 + $0x2] ss:$0 sm:$0xff] }
 0x3a3   : > { %1290 = vmatpush3.bf16.msra.mxu1 %v1407_v39 }
 0x461   : > { %v736_v57 = vpop.f32.mrb[0].mxu1 }
 0x462   : > { %v785_v58 = vadd.f32 %v736_v57, %v617_v56  ;;  %v1267_v59 = vpop.f32.mrb[1].mxu1 }
 0x463   : > { %v739_v60 = vpop.f32.mrb[2].mxu1 }
 0x464   : > { %v1268_v61 = vpop.f32.mrb[3].mxu1  ;;  %v789_v62 = vsel %vm507_vm2, %v785_v58, 0.0 }
 0x465   : > { %790 = vadd.xlane.f32.xlu1 %v789_v62 }
 0x469   : > { %v779_v0 = vpop.f32.mrb[4].mxu1 }
 0x46a   : > { %v786_v1 = vadd.f32 %v779_v0, %v618_v63  ;;  %v1273_v3 = vpop.f32.mrb[5].mxu1 }
 0x46b   : > { %v782_v4 = vpop.f32.mrb[6].mxu1 }
 0x46c   : > { %v1274_v5 = vpop.f32.mrb[7].mxu1  ;;  %v792_v6 = vsel %vm507_vm2, %v786_v1, 0.0 }
 0x46d   : > { %793 = vadd.xlane.f32.xlu1 %v792_v6 }
 0x4f2   : > { %v791_v7 = vpop.xlane.xlu1 %790 }
 0x4f3   : > { %v796_v8 = vmul.f32 0.03125, %v791_v7 }
 0x4f5   : > { %v798_v9 = vsub.f32 %v785_v58, %v796_v8 }
 0x4f7   : > { %v800_v10 = vmul.f32 %v798_v9, %v798_v9 }
 0x4f9   : > { %v802_v11 = vsel %vm507_vm2, %v800_v10, 0.0 }
 0x4fa   : > { %803 = vadd.xlane.f32.xlu0 %v802_v11  ;;  %v794_v12 = vpop.xlane.xlu1 %793 }
 0x4fb   : > { %v797_v13 = vmul.f32 0.03125, %v794_v12 }
 0x4fd   : > { %v799_v14 = vsub.f32 %v786_v1, %v797_v13 }
 0x4ff   : > { %v801_v15 = vmul.f32 %v799_v14, %v799_v14 }
 0x501   : > { %v805_v16 = vsel %vm507_vm2, %v801_v15, 0.0 }
 0x502   : > { %806 = vadd.xlane.f32.xlu1 %v805_v16 }
 0x587   : > { %v804_v21 = vpop.xlane.xlu0 %803 }
 0x588   : > { %v808_v22 = vmul.f32 0.03125, %v804_v21 }
 0x58a   : > { %v810_v23 = vadd.f32 1e-05, %v808_v22 }
 0x58c   : > { %1417 = vrsqrt.f32 %v810_v23 }
 0x58f   : > { %v807_v24 = vpop.xlane.xlu1 %806 }
 0x590   : > { %v809_v25 = vmul.f32 0.03125, %v807_v24 }
 0x592   : > { %v811_v26 = vadd.f32 1e-05, %v809_v25 }
 0x594   : > { %1419 = vrsqrt.f32 %v811_v26 }
 0x596   : > { %v1418_v27 = vpop.eup %1417 }
 0x597   : > { %v814_v28 = vmul.f32 %v1418_v27, %v798_v9 }
 0x599   : > { %v820_v31 = vmul.f32 %v1207_v29, %v814_v28 }
 0x59b   : > { %v826_v35 = vadd.f32 %v1208_v33, %v820_v31 }
 0x59e   : > { %v1420_v30 = vpop.eup %1419 }
 0x59f   : > { %v815_v32 = vmul.f32 %v1420_v30, %v799_v14  ;;  %v1219_v14 = vld [vmem:[#allocation10 + $0x5] ss:$0 sm:$0xff] }
 0x5a1   : > { %v821_v34 = vmul.f32 %v1207_v29, %v815_v32 }
 0x5a3   : > { %v827_v36 = vadd.f32 %v1208_v33, %v821_v34 }
 0x5a5   : > { %v828_v37 = vpack.c.bf16 %v827_v36, %v826_v35 }
 0x5a7   : > { %1280 = vmatmul.mubr.msk.bf16.vlgmr.msra.gmra.mrb[12].mxu0 %vm507_vm2, %v828_v37 }
 0x67a   : > { %v889_v41 = vpop.f32.mrb[12].mxu0 }
 0x67b   : > { %v890_v42 = vadd.f32 %v1209_v40, %v889_v41  ;;  %v1281_v43 = vpop.f32.mrb[13].mxu0 }
 0x67c   : > { %v892_v44 = vpop.f32.mrb[14].mxu0 }
 0x67d   : > { %v893_v45 = vadd.f32 %v1209_v40, %v892_v44  ;;  %v1282_v46 = vpop.f32.mrb[15].mxu0  ;;  %v896_v47 = vmax.f32 %v890_v42, 0.0 }
 0x67f   : > { %v897_v48 = vmax.f32 %v893_v45, 0.0 }
 0x681   : > { %v898_v49 = vpack.c.bf16 %v897_v48, %v896_v47 }
 0x683   : > { %1292 = vmatmul.mubr.msk.bf16.vlgmr.msra.gmra.mrb[8].mxu1 %vm936_vm5, %v898_v49 }
 0x756   : > { %v974_v50 = vpop.f32.mrb[8].mxu1 }
 0x757   : > { %v975_v51 = vadd.f32 %v1213_v2, %v974_v50  ;;  %v1293_v52 = vpop.f32.mrb[9].mxu1 }
 0x758   : > { %v977_v53 = vpop.f32.mrb[10].mxu1 }
 0x759   : > { %v978_v54 = vadd.f32 %v1213_v2, %v977_v53  ;;  %v1294_v55 = vpop.f32.mrb[11].mxu1  ;;  %v981_v56 = vadd.f32 %v975_v51, %v826_v35 }
 0x75b   : > { %v985_v57 = vsel %vm507_vm2, %v981_v56, 0.0  ;;  %v982_v58 = vadd.f32 %v978_v54, %v827_v36 }
 0x75c   : > { %986 = vadd.xlane.f32.xlu0 %v985_v57 }
 0x75d   : > { %v988_v59 = vsel %vm507_vm2, %v982_v58, 0.0 }
 0x75e   : > { %989 = vadd.xlane.f32.xlu1 %v988_v59 }
 0x7e9   : > { %v987_v60 = vpop.xlane.xlu0 %986 }
 0x7ea   : > { %v991_v61 = vmul.f32 0.03125, %v987_v60 }
 0x7eb   : > { %v990_v62 = vpop.xlane.xlu1 %989 }
 0x7ec   : > { %v993_v63 = vsub.f32 %v981_v56, %v991_v61  ;;  %v992_v0 = vmul.f32 0.03125, %v990_v62 }
 0x7ee   : > { %v994_v1 = vsub.f32 %v982_v58, %v992_v0  ;;  %v995_v3 = vmul.f32 %v993_v63, %v993_v63 }
 0x7f0   : > { %v997_v4 = vsel %vm507_vm2, %v995_v3, 0.0  ;;  %v996_v5 = vmul.f32 %v994_v1, %v994_v1 }
 0x7f1   : > { %998 = vadd.xlane.f32.xlu0 %v997_v4 }
 0x7f2   : > { %v1000_v6 = vsel %vm507_vm2, %v996_v5, 0.0 }
 0x7f3   : > { %1001 = vadd.xlane.f32.xlu1 %v1000_v6 }
 0x87e   : > { %v999_v7 = vpop.xlane.xlu0 %998 }
 0x87f   : > { %v1003_v8 = vmul.f32 0.03125, %v999_v7 }
 0x880   : > { %v1002_v9 = vpop.xlane.xlu1 %1001 }
 0x881   : > { %v1005_v10 = vadd.f32 1e-05, %v1003_v8  ;;  %v1004_v11 = vmul.f32 0.03125, %v1002_v9 }
 0x883   : > { %1421 = vrsqrt.f32 %v1005_v10  ;;  %v1006_v12 = vadd.f32 1e-05, %v1004_v11 }
 0x885   : > { %1423 = vrsqrt.f32 %v1006_v12 }
 0x88d   : > { %v1422_v13 = vpop.eup %1421 }
 0x88e   : > { %v1009_v15 = vmul.f32 %v1422_v13, %v993_v63 }
 0x88f   : > { %v1424_v16 = vpop.eup %1423 }
 0x890   : > { %v1015_v18 = vmul.f32 %v1219_v14, %v1009_v15  ;;  %v1010_v19 = vmul.f32 %v1424_v16, %v994_v1 }
 0x892   : > { %v1021_v20 = vadd.f32 %v1220_v17, %v1015_v18  ;;  %v1016_v21 = vmul.f32 %v1219_v14, %v1010_v19 }
 0x894   : > { %v1023_v22 = vpack.c.bf16 %v1021_v20, %v1021_v20  ;;  %v1022_v23 = vadd.f32 %v1220_v17, %v1016_v21 }
 0x896   : > { %v1024_v24 = vpack.c.bf16 %v1022_v23, %v1022_v23  ;;  %1026 = vst.msk [vmem:[%s437_s25] sm:$0xf] %vm1025_vm6, %v1023_v22 }
 0x898   : > { %1027 = vst.msk [vmem:[%s437_s25 + $0x4] sm:$0xf] %vm1025_vm6, %v1024_v24 }
 0x899   : > { %1550 = shalt.err (!%p1547_p10)
}
 0x89a   : > { %s1551_s15 = scalar_lea.hbm %s1955_s19, 128  ;;  %s1555_s8 = scalar_lea.hbm %s2045_s23, 512 }
 0x89b   : > { %p1552_p0 = scmp.ne.s32.totalorder %s1955_s19, %s1551_s15  ;;  %p1556_p1 = scmp.lt.u32.totalorder %s1955_s19, %s2045_s23 }
 0x89c   : > { %p1557_p3 = scmp.lt.u32.totalorder %s1555_s8, %s1551_s15  ;;  %p1559_p12 = scmp.lt.u32.totalorder %s1551_s15, %s1955_s19 }
 0x89d   : > { %p1553_p4 = pnand %p1552_p0, %p2046_p13 }
 0x89e   : > { %p1558_p11 = por %p1557_p3, %p1556_p1 }
 0x89f   : > { %p1554_p5 = pneg %p1553_p4 }
 0x8a0   : > { %p1560_p2 = por %p1559_p12, %p1558_p11 }
 0x8a2   : > { %p1561_p6 = pnand %p1560_p2, %p1554_p5 }
 0x8a4   : > { %1564 = shalt.err (!%p1561_p6)
}
 0x8a5   : > { %s1638_s22 = smov 64   ;;  %s1639_s14 = smov 256  }
 0x8a6   : > { %s1640_s25 = smov 4  }
 0x8a7   : > { %1311 = dma.vmem_to_hbm [thread:$0]  (%p2046_p13), %s1957_s13, 128, %s1955_s19, %s1961_s30, %s1638_s22, %s1639_s14, %s1640_s25  }
 0x8a8 PF: > { %s2047_s21 = sld [smem:[#allocation17_spill]]  ;;  %s2048_s24 = sld [smem:[#allocation21_spill]] }
 0x8a9   : > { %p1338_p7 = scmp.ge.s32.totalorder %s1627_s10, 2 }
 0x8ae   : > { %s1059_s27 = sand.u32 1, %s2047_s21   ;;  %p2049_p8 = scmp.ne.s32.totalorder %s2048_s24, 0 }
 0x8af   : > { %s1060_s26 = scalar_lea.sflag [#allocation6], %s1059_s27 }
 0x8b0   : > { %p1327_p9 = pnand %p1338_p7, %p2049_p8 }
 0x8b2   : > { %1602 = dma.done.wait (!%p1327_p9), %s1060_s26, 128  }
 0x8b3   : > { %1604 = vsyncadd (!%p1327_p9), %s1060_s26, 4294967168  ;;  %s24_s10 = sadd.s32 1, %s1627_s10   ;;  %s2050_s11 = sld [smem:[#allocation20_spill]] }
 0x8b4   : > { %p21_p10 = scmp.ge.s32.totalorder %s24_s10, 6   ;;  %s2051_s20 = sld [smem:[#allocation18_spill]] }
 0x8b5   : > { %s2052_s27 = smov %s1611_s28  ;;  %s2053_s28 = smov %s1615_s29 }
 0x8b6   : > { %s2055_s30 = smov %s1623_s9  ;;  %23 = sbr.rel (!%p21_p10) target bundleno = 10 (0xa), region = 157 }
 0x8b9   : > { %s2054_s29 = smov %s2050_s11 }
 0x8ba   : > { %s2056_s9 = smov %s2051_s20 }
 0x8bd   :  { %1065 = vsyncpa [#allocation5], 1 }
 0x8be   :  { %1067 = vsyncpa [#allocation5 + $0x1], 1 }
 0x8bf   :  { %1068 = vsyncpa [#allocation8], 1 }
 0x8c0   :  { %1069 = vsyncpa [#allocation11], 1 }
 0x8c1   :  { %1070 = vsyncpa [#allocation6], 1 }
 0x8c2   :  { %1072 = vsyncpa [#allocation6 + $0x1], 1 }

</bundles_post_ra>
